<compile_context>
chip_gen: v5e
topology: v5e:2x2
jax: 0.10.0
libtpu: 0.0.40
codegen_flags: <defaults>
</compile_context>

<pallas_src>
import math

import jax
import jax.numpy as jnp
from jax import lax
from jax.experimental import pallas as pl
from jax.experimental.pallas import tpu as pltpu

_SIGMA = 0.001
_INV_2SQRT3 = 1.0 / (2.0 * math.sqrt(3.0))
_EPS = 1e-12            # F.normalize default eps
_TINY = 1e-30           # guards rsqrt(0) in the half-angle path
_LANE = 128
_MAX_BLOCK_ROWS = 512   # 2.25 MiB/block; 2 bufs * (in+out) = 9 MiB < 16 MiB (v5e default)


def _cdiv(a, b):
    return -(-a // b)


def _round_up(a, b):
    return _cdiv(a, b) * b


def _num_tensorcores():
    """v7x has 2 TensorCores/chip; v5e/v6e have 1.  Only on multi-TC chips do we
    force >=2 balanced grid steps (sharded via 'parallel' semantics)."""
    try:
        kind = jax.devices()[0].device_kind.lower()
        if "v7" in kind:
            return 2
    except Exception:
        pass
    return 1


def _precise_rsqrt(t):
    """rsqrt with one explicit Newton-Raphson step: ~f32-accurate regardless of
    whether the backend rsqrt is the raw EUP approximation or already refined."""
    r = lax.rsqrt(t)
    return r * (jnp.float32(1.5) - jnp.float32(0.5) * t * r * r)


def _steiner_kernel(tri_ref, out_ref):
    # tri_ref / out_ref: (9, block_rows, 128) float32, channel-major SoA.
    #   input  channel = vertex*3 + coord
    #   output channel = coord*3 + column   (row-major 3x3 per face)
    v0x, v0y, v0z = tri_ref[0], tri_ref[1], tri_ref[2]
    v1x, v1y, v1z = tri_ref[3], tri_ref[4], tri_ref[5]
    v2x, v2y, v2z = tri_ref[6], tri_ref[7], tri_ref[8]

    third = jnp.float32(1.0 / 3.0)
    half = jnp.float32(0.5)
    cx = (v0x + v1x + v2x) * third
    cy = (v0y + v1y + v2y) * third
    cz = (v0z + v1z + v2z) * third

    # f1 = 0.5 * (v2 - centroid);  f2 = 1/(2*sqrt(3)) * (v1 - v0)
    f1x = half * (v2x - cx)
    f1y = half * (v2y - cy)
    f1z = half * (v2z - cz)
    k = jnp.float32(_INV_2SQRT3)
    f2x = k * (v1x - v0x)
    f2y = k * (v1y - v0y)
    f2z = k * (v1z - v0z)

    dot12 = f1x * f2x + f1y * f2y + f1z * f2z
    dot11 = f1x * f1x + f1y * f1y + f1z * f1z
    dot22 = f2x * f2x + f2y * f2y + f2z * f2z

    # ---- half-angle algebra replacing atan2 + cos + sin --------------------
    # Reference: t0 = atan2(p, q)/2 with p = 2*dot12, q = dot11 - dot22.
    p = dot12 + dot12
    q = dot11 - dot22
    rinv = _precise_rsqrt(jnp.maximum(p * p + q * q, jnp.float32(_TINY)))
    cos2t = q * rinv
    sin2t = p * rinv
    # Numerically stable half-angle: take the sqrt on the non-cancelling half,
    # recover the other half from sin(2t) = 2*sin(t)*cos(t).
    hbig = half * (jnp.float32(1.0) + jnp.abs(cos2t))   # >= 0.5, no guard needed
    rbig = _precise_rsqrt(hbig)
    big = hbig * rbig                                    # sqrt(hbig)
    small = half * jnp.abs(sin2t) * rbig
    q_nonneg = cos2t >= jnp.float32(0.0)
    c = jnp.where(q_nonneg, big, small)                  # cos(t0) >= 0, t0 in (-pi/2, pi/2]
    s_abs = jnp.where(q_nonneg, small, big)
    s = jnp.where(p >= jnp.float32(0.0), s_abs, -s_abs)
    # atan2(0, 0) = 0  =>  c = 1, s = 0 exactly (degenerate / equilateral faces,
    # also the zero-padded tail of the slab).
    degenerate = (p == jnp.float32(0.0)) & (q == jnp.float32(0.0))
    c = jnp.where(degenerate, jnp.float32(1.0), c)
    s = jnp.where(degenerate, jnp.float32(0.0), s)
    # ------------------------------------------------------------------------

    # axis0 = f1*cos(t0) + f2*sin(t0)
    a0x = f1x * c + f2x * s
    a0y = f1y * c + f2y * s
    a0z = f1z * c + f2z * s
    # axis1 = f1*cos(t0+pi/2) + f2*sin(t0+pi/2) = -f1*sin(t0) + f2*cos(t0)
    a1x = f2x * c - f1x * s
    a1y = f2y * c - f1y * s
    a1z = f2z * c - f1z * s

    # Store the six 2*axis channels early (shorter vreg live ranges).
    two = jnp.float32(2.0)
    out_ref[0] = two * a0x
    out_ref[3] = two * a0y
    out_ref[6] = two * a0z
    out_ref[1] = two * a1x
    out_ref[4] = two * a1y
    out_ref[7] = two * a1z

    # normal = normalize(cross(axis0, axis1)) * sigma   (rsqrt formulation,
    # exactly equal to dividing by max(||n||, eps))
    nx = a0y * a1z - a0z * a1y
    ny = a0z * a1x - a0x * a1z
    nz = a0x * a1y - a0y * a1x
    nn = nx * nx + ny * ny + nz * nz
    inv = lax.rsqrt(jnp.maximum(nn, jnp.float32(_EPS * _EPS))) * jnp.float32(_SIGMA)
    out_ref[2] = nx * inv
    out_ref[5] = ny * inv
    out_ref[8] = nz * inv


def _plan(n_faces, *, lane=_LANE, max_block_rows=_MAX_BLOCK_ROWS, num_cores=None):
    """Choose (rows_total, block_rows): rows_total = steps * block_rows, rows
    multiple of 8, block as large as allowed; on multi-TC chips force a
    balanced step count that is a multiple of the core count."""
    if num_cores is None:
        num_cores = _num_tensorcores()
    rows = _round_up(max(_cdiv(n_faces, lane), 1), 8)
    block_rows = min(max_block_rows, rows)
    steps = _cdiv(rows, block_rows)
    if num_cores > 1:
        steps = _round_up(steps, num_cores)
        block_rows = _round_up(_cdiv(rows, steps), 8)
        steps = _round_up(_cdiv(rows, block_rows), num_cores)
    return steps * block_rows, block_rows


def steiner_transform_soa(tri_soa, *, block_rows=None):
    """SoA-native (preferred) entry point: (9, rows, 128) -> (9, rows, 128).

    Input channel = vertex*3 + coord, output channel = coord*3 + column.
    No relayout: callers that keep the slab end-to-end pay only 72 B/face
    in + 72 B/face out of HBM traffic."""
    nine, rows, lane = tri_soa.shape
    assert nine == 9 and lane == _LANE and rows % 8 == 0
    if block_rows is None:
        block_rows = rows if rows <= _MAX_BLOCK_ROWS else next(
            c for c in (512, 256, 128, 64, 32, 16, 8) if rows % c == 0)
    assert rows % block_rows == 0
    n_elems = rows * lane
    return pl.pallas_call(
        _steiner_kernel,
        out_shape=jax.ShapeDtypeStruct((9, rows, lane), jnp.float32),
        grid_spec=pltpu.PrefetchScalarGridSpec(
            num_scalar_prefetch=0,
            grid=(rows // block_rows,),
            in_specs=[pl.BlockSpec((9, block_rows, lane), lambda r: (0, r, 0))],
            out_specs=pl.BlockSpec((9, block_rows, lane), lambda r: (0, r, 0)),
        ),
        compiler_params=pltpu.CompilerParams(
            dimension_semantics=("parallel",)),
        cost_estimate=pl.CostEstimate(
            flops=100 * n_elems,
            transcendentals=4 * n_elems,
            bytes_accessed=2 * 9 * 4 * n_elems),
    )(tri_soa)


def pack_triangles_soa(triangles, rows_total, lane=_LANE):
    """(B, NF, 3, 3) -> (9, rows_total, lane) f32; padded faces are zeros.
    # TODO(synk): this pad+transpose is an extra HBM pass; production callers
    # should build/keep the SoA slab directly (e.g. out of the LBS/gather
    # stage) and call steiner_transform_soa()."""
    B, NF = triangles.shape[:2]
    n = B * NF
    flat = jnp.reshape(triangles.astype(jnp.float32), (n, 9))
    n_pad = rows_total * lane
    if n_pad != n:
        flat = jnp.pad(flat, ((0, n_pad - n), (0, 0)))
    return jnp.transpose(flat, (1, 0)).reshape(9, rows_total, lane)


def unpack_transform_soa(out_soa, B, NF, lane=_LANE):
    rows_total = out_soa.shape[1]
    flat = jnp.transpose(out_soa.reshape(9, rows_total * lane), (1, 0))[: B * NF]
    return flat.reshape(B, NF, 3, 3)


def get_transformation_from_triangle_steiner(triangles, *, max_block_rows=_MAX_BLOCK_ROWS,
                                             num_cores=None):
    """(B, NF, 3, 3) float32 -> (B, NF, 3, 3) float32 (PyTorch-compatible wrapper)."""
    B, NF = triangles.shape[:2]
    rows_total, block_rows = _plan(B * NF, max_block_rows=max_block_rows,
                                   num_cores=num_cores)
    soa = pack_triangles_soa(triangles, rows_total)
    out = steiner_transform_soa(soa, block_rows=block_rows)
    return unpack_transform_soa(out, B, NF)


def _reference_steiner(triangles, sigma=_SIGMA):
    """Pure-JAX reference mirroring the PyTorch function (for verification)."""
    centroid = triangles.mean(axis=-2)
    f1 = 0.5 * (triangles[..., 2, :] - centroid)
    f2 = _INV_2SQRT3 * (triangles[..., 1, :] - triangles[..., 0, :])
    t0 = jnp.arctan2(
        (2 * f1 * f2).sum(-1), (f1 * f1).sum(-1) - (f2 * f2).sum(-1)
    ) / 2
    t0 = t0[..., None]
    axis0 = f1 * jnp.cos(t0) + f2 * jnp.sin(t0)
    axis1 = f1 * jnp.cos(t0 + math.pi / 2) + f2 * jnp.sin(t0 + math.pi / 2)
    normal = jnp.cross(axis0, axis1)
    normal = normal / jnp.maximum(
        jnp.linalg.norm(normal, axis=-1, keepdims=True), _EPS
    ) * sigma
    return jnp.stack([axis0 * 2, axis1 * 2, normal], axis=-1)


if __name__ == "__main__":
    key = jax.random.PRNGKey(0)
    B, NF = 2, 200  # small shapes: batch of 2, 200 faces, 3 verts x 3 coords
    triangles = jax.random.normal(key, (B, NF, 3, 3), dtype=jnp.float32)

    out = get_transformation_from_triangle_steiner(triangles)
    out = jax.block_until_ready(out)

    ref = _reference_steiner(triangles)
    assert out.shape == (B, NF, 3, 3)
    assert bool(jnp.allclose(out, ref, atol=1e-5, rtol=1e-5)), "mismatch vs reference"
    print("KERNEL_OK")
</pallas_src>

<mosaic_0001>
module attributes {stable_mosaic.version = 11 : i64} {
  func.func @_steiner_kernel(%arg0: i32, %arg1: memref<9x8x128xf32, #tpu.memory_space<vmem>>, %arg2: memref<9x8x128xf32, #tpu.memory_space<vmem>>) attributes {dimension_semantics = [#tpu.dimension_semantics<parallel>], iteration_bounds = array<i64: 1>, scalar_prefetch = 0 : i64, scratch_operands = 0 : i64, tpu.core_type = #tpu.core_type<tc>, window_params = [{transform_indices = @transform_0, window_bounds = array<i64: 9, 8, 128>}, {transform_indices = @transform_1, window_bounds = array<i64: 9, 8, 128>}]} {
    %c0 = arith.constant 0 : index
    %c0_0 = arith.constant 0 : index
    %c0_1 = arith.constant 0 : index
    %0 = vector.load %arg1[%c0, %c0_0, %c0_1] : memref<9x8x128xf32, #tpu.memory_space<vmem>>, vector<1x8x128xf32>
    %1 = vector.shape_cast %0 : vector<1x8x128xf32> to vector<8x128xf32>
    %c1 = arith.constant 1 : index
    %c0_2 = arith.constant 0 : index
    %c0_3 = arith.constant 0 : index
    %2 = vector.load %arg1[%c1, %c0_2, %c0_3] : memref<9x8x128xf32, #tpu.memory_space<vmem>>, vector<1x8x128xf32>
    %3 = vector.shape_cast %2 : vector<1x8x128xf32> to vector<8x128xf32>
    %c2 = arith.constant 2 : index
    %c0_4 = arith.constant 0 : index
    %c0_5 = arith.constant 0 : index
    %4 = vector.load %arg1[%c2, %c0_4, %c0_5] : memref<9x8x128xf32, #tpu.memory_space<vmem>>, vector<1x8x128xf32>
    %5 = vector.shape_cast %4 : vector<1x8x128xf32> to vector<8x128xf32>
    %c3 = arith.constant 3 : index
    %c0_6 = arith.constant 0 : index
    %c0_7 = arith.constant 0 : index
    %6 = vector.load %arg1[%c3, %c0_6, %c0_7] : memref<9x8x128xf32, #tpu.memory_space<vmem>>, vector<1x8x128xf32>
    %7 = vector.shape_cast %6 : vector<1x8x128xf32> to vector<8x128xf32>
    %c4 = arith.constant 4 : index
    %c0_8 = arith.constant 0 : index
    %c0_9 = arith.constant 0 : index
    %8 = vector.load %arg1[%c4, %c0_8, %c0_9] : memref<9x8x128xf32, #tpu.memory_space<vmem>>, vector<1x8x128xf32>
    %9 = vector.shape_cast %8 : vector<1x8x128xf32> to vector<8x128xf32>
    %c5 = arith.constant 5 : index
    %c0_10 = arith.constant 0 : index
    %c0_11 = arith.constant 0 : index
    %10 = vector.load %arg1[%c5, %c0_10, %c0_11] : memref<9x8x128xf32, #tpu.memory_space<vmem>>, vector<1x8x128xf32>
    %11 = vector.shape_cast %10 : vector<1x8x128xf32> to vector<8x128xf32>
    %c6 = arith.constant 6 : index
    %c0_12 = arith.constant 0 : index
    %c0_13 = arith.constant 0 : index
    %12 = vector.load %arg1[%c6, %c0_12, %c0_13] : memref<9x8x128xf32, #tpu.memory_space<vmem>>, vector<1x8x128xf32>
    %13 = vector.shape_cast %12 : vector<1x8x128xf32> to vector<8x128xf32>
    %c7 = arith.constant 7 : index
    %c0_14 = arith.constant 0 : index
    %c0_15 = arith.constant 0 : index
    %14 = vector.load %arg1[%c7, %c0_14, %c0_15] : memref<9x8x128xf32, #tpu.memory_space<vmem>>, vector<1x8x128xf32>
    %15 = vector.shape_cast %14 : vector<1x8x128xf32> to vector<8x128xf32>
    %c8 = arith.constant 8 : index
    %c0_16 = arith.constant 0 : index
    %c0_17 = arith.constant 0 : index
    %16 = vector.load %arg1[%c8, %c0_16, %c0_17] : memref<9x8x128xf32, #tpu.memory_space<vmem>>, vector<1x8x128xf32>
    %17 = vector.shape_cast %16 : vector<1x8x128xf32> to vector<8x128xf32>
    %18 = arith.addf %1, %7 : vector<8x128xf32>
    %19 = arith.addf %18, %13 : vector<8x128xf32>
    %cst = arith.constant 0.333333343 : f32
    %20 = vector.broadcast %cst : f32 to vector<8x128xf32>
    %21 = arith.mulf %19, %20 : vector<8x128xf32>
    %22 = arith.addf %3, %9 : vector<8x128xf32>
    %23 = arith.addf %22, %15 : vector<8x128xf32>
    %cst_18 = arith.constant 0.333333343 : f32
    %24 = vector.broadcast %cst_18 : f32 to vector<8x128xf32>
    %25 = arith.mulf %23, %24 : vector<8x128xf32>
    %26 = arith.addf %5, %11 : vector<8x128xf32>
    %27 = arith.addf %26, %17 : vector<8x128xf32>
    %cst_19 = arith.constant 0.333333343 : f32
    %28 = vector.broadcast %cst_19 : f32 to vector<8x128xf32>
    %29 = arith.mulf %27, %28 : vector<8x128xf32>
    %30 = arith.subf %13, %21 : vector<8x128xf32>
    %cst_20 = arith.constant 5.000000e-01 : f32
    %31 = vector.broadcast %cst_20 : f32 to vector<8x128xf32>
    %32 = arith.mulf %31, %30 : vector<8x128xf32>
    %33 = arith.subf %15, %25 : vector<8x128xf32>
    %cst_21 = arith.constant 5.000000e-01 : f32
    %34 = vector.broadcast %cst_21 : f32 to vector<8x128xf32>
    %35 = arith.mulf %34, %33 : vector<8x128xf32>
    %36 = arith.subf %17, %29 : vector<8x128xf32>
    %cst_22 = arith.constant 5.000000e-01 : f32
    %37 = vector.broadcast %cst_22 : f32 to vector<8x128xf32>
    %38 = arith.mulf %37, %36 : vector<8x128xf32>
    %39 = arith.subf %7, %1 : vector<8x128xf32>
    %cst_23 = arith.constant 0.288675129 : f32
    %40 = vector.broadcast %cst_23 : f32 to vector<8x128xf32>
    %41 = arith.mulf %40, %39 : vector<8x128xf32>
    %42 = arith.subf %9, %3 : vector<8x128xf32>
    %cst_24 = arith.constant 0.288675129 : f32
    %43 = vector.broadcast %cst_24 : f32 to vector<8x128xf32>
    %44 = arith.mulf %43, %42 : vector<8x128xf32>
    %45 = arith.subf %11, %5 : vector<8x128xf32>
    %cst_25 = arith.constant 0.288675129 : f32
    %46 = vector.broadcast %cst_25 : f32 to vector<8x128xf32>
    %47 = arith.mulf %46, %45 : vector<8x128xf32>
    %48 = arith.mulf %32, %41 : vector<8x128xf32>
    %49 = arith.mulf %35, %44 : vector<8x128xf32>
    %50 = arith.addf %48, %49 : vector<8x128xf32>
    %51 = arith.mulf %38, %47 : vector<8x128xf32>
    %52 = arith.addf %50, %51 : vector<8x128xf32>
    %53 = arith.mulf %32, %32 : vector<8x128xf32>
    %54 = arith.mulf %35, %35 : vector<8x128xf32>
    %55 = arith.addf %53, %54 : vector<8x128xf32>
    %56 = arith.mulf %38, %38 : vector<8x128xf32>
    %57 = arith.addf %55, %56 : vector<8x128xf32>
    %58 = arith.mulf %41, %41 : vector<8x128xf32>
    %59 = arith.mulf %44, %44 : vector<8x128xf32>
    %60 = arith.addf %58, %59 : vector<8x128xf32>
    %61 = arith.mulf %47, %47 : vector<8x128xf32>
    %62 = arith.addf %60, %61 : vector<8x128xf32>
    %63 = arith.addf %52, %52 : vector<8x128xf32>
    %64 = arith.subf %57, %62 : vector<8x128xf32>
    %65 = arith.mulf %63, %63 : vector<8x128xf32>
    %66 = arith.mulf %64, %64 : vector<8x128xf32>
    %67 = arith.addf %65, %66 : vector<8x128xf32>
    %cst_26 = arith.constant 1.000000e-30 : f32
    %68 = vector.broadcast %cst_26 : f32 to vector<8x128xf32>
    %69 = arith.maximumf %67, %68 : vector<8x128xf32>
    %70 = math.rsqrt %69 : vector<8x128xf32>
    %cst_27 = arith.constant 5.000000e-01 : f32
    %71 = vector.broadcast %cst_27 : f32 to vector<8x128xf32>
    %72 = arith.mulf %71, %69 : vector<8x128xf32>
    %73 = arith.mulf %72, %70 : vector<8x128xf32>
    %74 = arith.mulf %73, %70 : vector<8x128xf32>
    %cst_28 = arith.constant 1.500000e+00 : f32
    %75 = vector.broadcast %cst_28 : f32 to vector<8x128xf32>
    %76 = arith.subf %75, %74 : vector<8x128xf32>
    %77 = arith.mulf %70, %76 : vector<8x128xf32>
    %78 = arith.mulf %64, %77 : vector<8x128xf32>
    %79 = arith.mulf %63, %77 : vector<8x128xf32>
    %80 = math.absf %78 : vector<8x128xf32>
    %cst_29 = arith.constant 1.000000e+00 : f32
    %81 = vector.broadcast %cst_29 : f32 to vector<8x128xf32>
    %82 = arith.addf %81, %80 : vector<8x128xf32>
    %cst_30 = arith.constant 5.000000e-01 : f32
    %83 = vector.broadcast %cst_30 : f32 to vector<8x128xf32>
    %84 = arith.mulf %83, %82 : vector<8x128xf32>
    %85 = math.rsqrt %84 : vector<8x128xf32>
    %cst_31 = arith.constant 5.000000e-01 : f32
    %86 = vector.broadcast %cst_31 : f32 to vector<8x128xf32>
    %87 = arith.mulf %86, %84 : vector<8x128xf32>
    %88 = arith.mulf %87, %85 : vector<8x128xf32>
    %89 = arith.mulf %88, %85 : vector<8x128xf32>
    %cst_32 = arith.constant 1.500000e+00 : f32
    %90 = vector.broadcast %cst_32 : f32 to vector<8x128xf32>
    %91 = arith.subf %90, %89 : vector<8x128xf32>
    %92 = arith.mulf %85, %91 : vector<8x128xf32>
    %93 = arith.mulf %84, %92 : vector<8x128xf32>
    %94 = math.absf %79 : vector<8x128xf32>
    %cst_33 = arith.constant 5.000000e-01 : f32
    %95 = vector.broadcast %cst_33 : f32 to vector<8x128xf32>
    %96 = arith.mulf %95, %94 : vector<8x128xf32>
    %97 = arith.mulf %96, %92 : vector<8x128xf32>
    %cst_34 = arith.constant 0.000000e+00 : f32
    %98 = vector.broadcast %cst_34 : f32 to vector<8x128xf32>
    %99 = arith.cmpf oge, %78, %98 : vector<8x128xf32>
    %100 = arith.select %99, %93, %97 : vector<8x128xi1>, vector<8x128xf32>
    %101 = arith.select %99, %97, %93 : vector<8x128xi1>, vector<8x128xf32>
    %cst_35 = arith.constant 0.000000e+00 : f32
    %102 = vector.broadcast %cst_35 : f32 to vector<8x128xf32>
    %103 = arith.cmpf oge, %63, %102 : vector<8x128xf32>
    %cst_36 = arith.constant 0.000000e+00 : f32
    %104 = vector.broadcast %cst_36 : f32 to vector<8x128xf32>
    %105 = arith.subf %104, %101 : vector<8x128xf32>
    %106 = arith.select %103, %101, %105 : vector<8x128xi1>, vector<8x128xf32>
    %cst_37 = arith.constant 0.000000e+00 : f32
    %107 = vector.broadcast %cst_37 : f32 to vector<8x128xf32>
    %108 = arith.cmpf oeq, %63, %107 : vector<8x128xf32>
    %cst_38 = arith.constant 0.000000e+00 : f32
    %109 = vector.broadcast %cst_38 : f32 to vector<8x128xf32>
    %110 = arith.cmpf oeq, %64, %109 : vector<8x128xf32>
    %111 = arith.andi %108, %110 : vector<8x128xi1>
    %cst_39 = arith.constant 1.000000e+00 : f32
    %112 = vector.broadcast %cst_39 : f32 to vector<8x128xf32>
    %113 = arith.select %111, %112, %100 : vector<8x128xi1>, vector<8x128xf32>
    %cst_40 = arith.constant 0.000000e+00 : f32
    %114 = vector.broadcast %cst_40 : f32 to vector<8x128xf32>
    %115 = arith.select %111, %114, %106 : vector<8x128xi1>, vector<8x128xf32>
    %116 = arith.mulf %32, %113 : vector<8x128xf32>
    %117 = arith.mulf %41, %115 : vector<8x128xf32>
    %118 = arith.addf %116, %117 : vector<8x128xf32>
    %119 = arith.mulf %35, %113 : vector<8x128xf32>
    %120 = arith.mulf %44, %115 : vector<8x128xf32>
    %121 = arith.addf %119, %120 : vector<8x128xf32>
    %122 = arith.mulf %38, %113 : vector<8x128xf32>
    %123 = arith.mulf %47, %115 : vector<8x128xf32>
    %124 = arith.addf %122, %123 : vector<8x128xf32>
    %125 = arith.mulf %41, %113 : vector<8x128xf32>
    %126 = arith.mulf %32, %115 : vector<8x128xf32>
    %127 = arith.subf %125, %126 : vector<8x128xf32>
    %128 = arith.mulf %44, %113 : vector<8x128xf32>
    %129 = arith.mulf %35, %115 : vector<8x128xf32>
    %130 = arith.subf %128, %129 : vector<8x128xf32>
    %131 = arith.mulf %47, %113 : vector<8x128xf32>
    %132 = arith.mulf %38, %115 : vector<8x128xf32>
    %133 = arith.subf %131, %132 : vector<8x128xf32>
    %cst_41 = arith.constant 2.000000e+00 : f32
    %134 = vector.broadcast %cst_41 : f32 to vector<8x128xf32>
    %135 = arith.mulf %134, %118 : vector<8x128xf32>
    %c0_42 = arith.constant 0 : index
    %c0_43 = arith.constant 0 : index
    %c0_44 = arith.constant 0 : index
    %136 = vector.load %arg2[%c0_42, %c0_43, %c0_44] : memref<9x8x128xf32, #tpu.memory_space<vmem>>, vector<1x8x128xf32>
    %137 = vector.shape_cast %136 : vector<1x8x128xf32> to vector<8x128xf32>
    %138 = vector.shape_cast %135 : vector<8x128xf32> to vector<1x8x128xf32>
    tpu.vector_store %arg2[%c0_42, %c0_43, %c0_44], %138 {strides = array<i32>} : memref<9x8x128xf32, #tpu.memory_space<vmem>>, vector<1x8x128xf32>,
    %cst_45 = arith.constant 2.000000e+00 : f32
    %139 = vector.broadcast %cst_45 : f32 to vector<8x128xf32>
    %140 = arith.mulf %139, %121 : vector<8x128xf32>
    %c3_46 = arith.constant 3 : index
    %c0_47 = arith.constant 0 : index
    %c0_48 = arith.constant 0 : index
    %141 = vector.load %arg2[%c3_46, %c0_47, %c0_48] : memref<9x8x128xf32, #tpu.memory_space<vmem>>, vector<1x8x128xf32>
    %142 = vector.shape_cast %141 : vector<1x8x128xf32> to vector<8x128xf32>
    %143 = vector.shape_cast %140 : vector<8x128xf32> to vector<1x8x128xf32>
    tpu.vector_store %arg2[%c3_46, %c0_47, %c0_48], %143 {strides = array<i32>} : memref<9x8x128xf32, #tpu.memory_space<vmem>>, vector<1x8x128xf32>,
    %cst_49 = arith.constant 2.000000e+00 : f32
    %144 = vector.broadcast %cst_49 : f32 to vector<8x128xf32>
    %145 = arith.mulf %144, %124 : vector<8x128xf32>
    %c6_50 = arith.constant 6 : index
    %c0_51 = arith.constant 0 : index
    %c0_52 = arith.constant 0 : index
    %146 = vector.load %arg2[%c6_50, %c0_51, %c0_52] : memref<9x8x128xf32, #tpu.memory_space<vmem>>, vector<1x8x128xf32>
    %147 = vector.shape_cast %146 : vector<1x8x128xf32> to vector<8x128xf32>
    %148 = vector.shape_cast %145 : vector<8x128xf32> to vector<1x8x128xf32>
    tpu.vector_store %arg2[%c6_50, %c0_51, %c0_52], %148 {strides = array<i32>} : memref<9x8x128xf32, #tpu.memory_space<vmem>>, vector<1x8x128xf32>,
    %cst_53 = arith.constant 2.000000e+00 : f32
    %149 = vector.broadcast %cst_53 : f32 to vector<8x128xf32>
    %150 = arith.mulf %149, %127 : vector<8x128xf32>
    %c1_54 = arith.constant 1 : index
    %c0_55 = arith.constant 0 : index
    %c0_56 = arith.constant 0 : index
    %151 = vector.load %arg2[%c1_54, %c0_55, %c0_56] : memref<9x8x128xf32, #tpu.memory_space<vmem>>, vector<1x8x128xf32>
    %152 = vector.shape_cast %151 : vector<1x8x128xf32> to vector<8x128xf32>
    %153 = vector.shape_cast %150 : vector<8x128xf32> to vector<1x8x128xf32>
    tpu.vector_store %arg2[%c1_54, %c0_55, %c0_56], %153 {strides = array<i32>} : memref<9x8x128xf32, #tpu.memory_space<vmem>>, vector<1x8x128xf32>,
    %cst_57 = arith.constant 2.000000e+00 : f32
    %154 = vector.broadcast %cst_57 : f32 to vector<8x128xf32>
    %155 = arith.mulf %154, %130 : vector<8x128xf32>
    %c4_58 = arith.constant 4 : index
    %c0_59 = arith.constant 0 : index
    %c0_60 = arith.constant 0 : index
    %156 = vector.load %arg2[%c4_58, %c0_59, %c0_60] : memref<9x8x128xf32, #tpu.memory_space<vmem>>, vector<1x8x128xf32>
    %157 = vector.shape_cast %156 : vector<1x8x128xf32> to vector<8x128xf32>
    %158 = vector.shape_cast %155 : vector<8x128xf32> to vector<1x8x128xf32>
    tpu.vector_store %arg2[%c4_58, %c0_59, %c0_60], %158 {strides = array<i32>} : memref<9x8x128xf32, #tpu.memory_space<vmem>>, vector<1x8x128xf32>,
    %cst_61 = arith.constant 2.000000e+00 : f32
    %159 = vector.broadcast %cst_61 : f32 to vector<8x128xf32>
    %160 = arith.mulf %159, %133 : vector<8x128xf32>
    %c7_62 = arith.constant 7 : index
    %c0_63 = arith.constant 0 : index
    %c0_64 = arith.constant 0 : index
    %161 = vector.load %arg2[%c7_62, %c0_63, %c0_64] : memref<9x8x128xf32, #tpu.memory_space<vmem>>, vector<1x8x128xf32>
    %162 = vector.shape_cast %161 : vector<1x8x128xf32> to vector<8x128xf32>
    %163 = vector.shape_cast %160 : vector<8x128xf32> to vector<1x8x128xf32>
    tpu.vector_store %arg2[%c7_62, %c0_63, %c0_64], %163 {strides = array<i32>} : memref<9x8x128xf32, #tpu.memory_space<vmem>>, vector<1x8x128xf32>,
    %164 = arith.mulf %121, %133 : vector<8x128xf32>
    %165 = arith.mulf %124, %130 : vector<8x128xf32>
    %166 = arith.subf %164, %165 : vector<8x128xf32>
    %167 = arith.mulf %124, %127 : vector<8x128xf32>
    %168 = arith.mulf %118, %133 : vector<8x128xf32>
    %169 = arith.subf %167, %168 : vector<8x128xf32>
    %170 = arith.mulf %118, %130 : vector<8x128xf32>
    %171 = arith.mulf %121, %127 : vector<8x128xf32>
    %172 = arith.subf %170, %171 : vector<8x128xf32>
    %173 = arith.mulf %166, %166 : vector<8x128xf32>
    %174 = arith.mulf %169, %169 : vector<8x128xf32>
    %175 = arith.addf %173, %174 : vector<8x128xf32>
    %176 = arith.mulf %172, %172 : vector<8x128xf32>
    %177 = arith.addf %175, %176 : vector<8x128xf32>
    %cst_65 = arith.constant 1.000000e-24 : f32
    %178 = vector.broadcast %cst_65 : f32 to vector<8x128xf32>
    %179 = arith.maximumf %177, %178 : vector<8x128xf32>
    %180 = math.rsqrt %179 : vector<8x128xf32>
    %cst_66 = arith.constant 1.000000e-03 : f32
    %181 = vector.broadcast %cst_66 : f32 to vector<8x128xf32>
    %182 = arith.mulf %180, %181 : vector<8x128xf32>
    %183 = arith.mulf %166, %182 : vector<8x128xf32>
    %c2_67 = arith.constant 2 : index
    %c0_68 = arith.constant 0 : index
    %c0_69 = arith.constant 0 : index
    %184 = vector.load %arg2[%c2_67, %c0_68, %c0_69] : memref<9x8x128xf32, #tpu.memory_space<vmem>>, vector<1x8x128xf32>
    %185 = vector.shape_cast %184 : vector<1x8x128xf32> to vector<8x128xf32>
    %186 = vector.shape_cast %183 : vector<8x128xf32> to vector<1x8x128xf32>
    tpu.vector_store %arg2[%c2_67, %c0_68, %c0_69], %186 {strides = array<i32>} : memref<9x8x128xf32, #tpu.memory_space<vmem>>, vector<1x8x128xf32>,
    %187 = arith.mulf %169, %182 : vector<8x128xf32>
    %c5_70 = arith.constant 5 : index
    %c0_71 = arith.constant 0 : index
    %c0_72 = arith.constant 0 : index
    %188 = vector.load %arg2[%c5_70, %c0_71, %c0_72] : memref<9x8x128xf32, #tpu.memory_space<vmem>>, vector<1x8x128xf32>
    %189 = vector.shape_cast %188 : vector<1x8x128xf32> to vector<8x128xf32>
    %190 = vector.shape_cast %187 : vector<8x128xf32> to vector<1x8x128xf32>
    tpu.vector_store %arg2[%c5_70, %c0_71, %c0_72], %190 {strides = array<i32>} : memref<9x8x128xf32, #tpu.memory_space<vmem>>, vector<1x8x128xf32>,
    %191 = arith.mulf %172, %182 : vector<8x128xf32>
    %c8_73 = arith.constant 8 : index
    %c0_74 = arith.constant 0 : index
    %c0_75 = arith.constant 0 : index
    %192 = vector.load %arg2[%c8_73, %c0_74, %c0_75] : memref<9x8x128xf32, #tpu.memory_space<vmem>>, vector<1x8x128xf32>
    %193 = vector.shape_cast %192 : vector<1x8x128xf32> to vector<8x128xf32>
    %194 = vector.shape_cast %191 : vector<8x128xf32> to vector<1x8x128xf32>
    tpu.vector_store %arg2[%c8_73, %c0_74, %c0_75], %194 {strides = array<i32>} : memref<9x8x128xf32, #tpu.memory_space<vmem>>, vector<1x8x128xf32>,
    return
  }
  func.func @transform_0(%arg0: i32) -> (i32, i32, i32) {
    %c0_i32 = arith.constant 0 : i32
    %c0_i32_0 = arith.constant 0 : i32
    %c0_i32_1 = arith.constant 0 : i32
    return %c0_i32, %arg0, %c0_i32_0 : i32, i32, i32
  }
  func.func @transform_1(%arg0: i32) -> (i32, i32, i32) {
    %c0_i32 = arith.constant 0 : i32
    %c0_i32_0 = arith.constant 0 : i32
    %c0_i32_1 = arith.constant 0 : i32
    return %c0_i32, %arg0, %c0_i32_0 : i32, i32, i32
  }
}

</mosaic_0001>

<bundles_post_ra>
// kernel: tpu_custom_call.1
= control target key start
LH: loop header
LB: loop body
LE: loop exit
PB: predicated region body
PF: predicated region fallthrough
CT: control target
= control target key end

     0   :  { %6 = vsyncpa [#allocation3], 0  ;;  %s361_s0 = inlined_call_operand.hbm [shape: f32[9,8,128], index: 0, kind: input, shape index: {}]   ;;  %s362_s1 = inlined_call_operand.hbm [shape: f32[9,8,128], index: 1, kind: output, shape index: {}]  }
   0x1   :  { %7 = vsyncpa [#allocation4], 0  ;;  %s12_s8 = sshll.u32 %s361_s0, 4  ;;  %s285_s9 = smov [#allocation2]   ;;  %s13_s8 = int_to_ptr.hbm [resolvable:$true] %s12_s8 }
   0x2   :  { %s14_s10 = sshll.u32 %s285_s9, 4  ;;  %s286_s11 = smov 128   ;;  %s15_s10 = int_to_ptr.vmem [resolvable:$true] %s14_s10 }
   0x3   :  { %s287_s12 = smov 8  }
   0x4   :  { %20 = dma.hbm_to_vmem [thread:$0]  %s13_s8, 1152, %s15_s10, [#allocation3], %s286_s11, %s286_s11, %s287_s12  }
   0x5   :  { %281 = dma.done.wait [#allocation3], 1152  }
   0x6   :  { %282 = vsyncadd [#allocation3], 4294966144  ;;  %v25_v0 = vld [vmem:[#allocation2] sm:$0xff]  ;;  %v27_v1 = vld [vmem:[#allocation2 + $0x8] sm:$0xff]  ;;  %s288_s0 = smov [#allocation5]   ;;  %s210_s16 = sshll.u32 %s362_s1, 4  ;;  %s211_s16 = int_to_ptr.hbm [resolvable:$true] %s210_s16 }
   0x7   :  { %v29_v2 = vld [vmem:[#allocation2 + $0x10] sm:$0xff]  ;;  %v31_v3 = vld [vmem:[#allocation2 + $0x18] sm:$0xff]  ;;  %v33_v4 = vld [vmem:[#allocation2 + $0x20] sm:$0xff]  ;;  %s208_s13 = sshll.u32 %s288_s0, 4  ;;  %s209_s13 = int_to_ptr.vmem [resolvable:$true] %s208_s13 }
   0x8   :  { %v35_v5 = vld [vmem:[#allocation2 + $0x28] sm:$0xff]  ;;  %v37_v6 = vld [vmem:[#allocation2 + $0x30] sm:$0xff]  ;;  %v39_v7 = vld [vmem:[#allocation2 + $0x38] sm:$0xff]  ;;  %v42_v9 = vadd.f32 %v31_v3, %v25_v0  ;;  %v45_v10 = vadd.f32 %v33_v4, %v27_v1  ;;  %v57_v12 = vsub.f32 %v31_v3, %v25_v0  ;;  %v59_v13 = vsub.f32 %v33_v4, %v27_v1 }
   0x9   :  { %v41_v8 = vld [vmem:[#allocation2 + $0x40] sm:$0xff]  ;;  %v48_v11 = vadd.f32 %v35_v5, %v29_v2  ;;  %v61_v14 = vsub.f32 %v35_v5, %v29_v2 }
   0xa   :  { %v43_v15 = vadd.f32 %v42_v9, %v37_v6  ;;  %v46_v16 = vadd.f32 %v45_v10, %v39_v7  ;;  %v305_v18 = vmul.f32 0.28867513, %v57_v12  ;;  %v307_v19 = vmul.f32 0.28867513, %v59_v13 }
   0xb   :  { %v49_v17 = vadd.f32 %v48_v11, %v41_v8  ;;  %v309_v23 = vmul.f32 0.28867513, %v61_v14 }
   0xc   :  { %v44_v20 = vmul.f32 0.33333334, %v43_v15  ;;  %v47_v21 = vmul.f32 0.33333334, %v46_v16  ;;  %v73_v24 = vmul.f32 %v305_v18, %v305_v18  ;;  %v74_v25 = vmul.f32 %v307_v19, %v307_v19 }
   0xd   :  { %v50_v22 = vmul.f32 0.33333334, %v49_v17  ;;  %v76_v33 = vmul.f32 %v309_v23, %v309_v23 }
   0xe   :  { %v51_v26 = vsub.f32 %v37_v6, %v44_v20  ;;  %v53_v27 = vsub.f32 %v39_v7, %v47_v21  ;;  %v75_v32 = vadd.f32 %v74_v25, %v73_v24 }
   0xf   :  { %v55_v28 = vsub.f32 %v41_v8, %v50_v22 }
  0x10   :  { %v315_v29 = vmul.f32 0.5, %v51_v26  ;;  %v317_v30 = vmul.f32 0.5, %v53_v27  ;;  %v77_v42 = vadd.f32 %v76_v33, %v75_v32 }
  0x11   :  { %v319_v31 = vmul.f32 0.5, %v55_v28 }
  0x12   :  { %v63_v34 = vmul.f32 %v305_v18, %v315_v29  ;;  %v64_v35 = vmul.f32 %v307_v19, %v317_v30  ;;  %v68_v37 = vmul.f32 %v315_v29, %v315_v29  ;;  %v69_v38 = vmul.f32 %v317_v30, %v317_v30 }
  0x13   :  { %v66_v36 = vmul.f32 %v309_v23, %v319_v31  ;;  %v71_v39 = vmul.f32 %v319_v31, %v319_v31 }
  0x14   :  { %v65_v40 = vadd.f32 %v64_v35, %v63_v34  ;;  %v70_v41 = vadd.f32 %v69_v38, %v68_v37 }
  0x16   :  { %v67_v43 = vadd.f32 %v66_v36, %v65_v40  ;;  %v72_v44 = vadd.f32 %v71_v39, %v70_v41 }
  0x18   :  { %v78_v45 = vadd.f32 %v67_v43, %v67_v43  ;;  %v79_v46 = vsub.f32 %v72_v44, %v77_v42 }
  0x1a   :  { %v80_v47 = vmul.f32 %v78_v45, %v78_v45  ;;  %v81_v48 = vmul.f32 %v79_v46, %v79_v46  ;;  %vm129_vm3 = vcmp.eq.f32.partialorder %v78_v45, 0.0  ;;  %vm130_vm4 = vcmp.eq.f32.partialorder %v79_v46, 0.0 }
  0x1b   :  { %vm335_vm5 = vmand %vm129_vm3, %vm130_vm4  ;;  %vm126_vm10 = vcmp.ge.f32.partialorder %v78_v45, 0.0 }
  0x1c   :  { %v82_v49 = vadd.f32 %v81_v48, %v80_v47 }
  0x1e   :  { %v83_v50 = vmax.f32 %v82_v49, 1e-30 }
  0x20   :  { %227 = vrsqrt.f32 %v83_v50  ;;  %vm90_vm0 = vweird.f32 %v83_v50  ;;  %v94_v56 = vmul.f32 0.5, %v83_v50 }
  0x26   :  { %v228_v51 = vpop.eup %227 }
  0x27   :  { %v85_v52 = vmul.f32 %v228_v51, %v83_v50  ;;  %vm91_vm1 = vweird.f32 %v228_v51 }
  0x28   :  { %vm92_vm2 = vmor %vm90_vm0, %vm91_vm1 }
  0x29   :  { %v86_v53 = vmul.f32 %v228_v51, %v85_v52 }
  0x2b   :  { %v87_v54 = vmul.f32 0.5, %v86_v53 }
  0x2d   :  { %v88_v55 = vsub.f32 1.5, %v87_v54 }
  0x2f   :  { %v89_v57 = vmul.f32 %v228_v51, %v88_v55 }
  0x31   :  { %v93_v58 = vsel %vm92_vm2, %v228_v51, %v89_v57 }
  0x32   :  { %v95_v59 = vmul.f32 %v94_v56, %v93_v58 }
  0x34   :  { %v96_v60 = vmul.f32 %v95_v59, %v93_v58 }
  0x36   :  { %v97_v61 = vsub.f32 1.5, %v96_v60 }
  0x38   :  { %v98_v62 = vmul.f32 %v97_v61, %v93_v58 }
  0x3a   :  { %v99_v63 = vmul.f32 %v98_v62, %v79_v46  ;;  %v100_v9 = vmul.f32 %v98_v62, %v78_v45 }
  0x3c   :  { %v101_v0 = vand.u32 2147483647, %v99_v63  ;;  %v120_v14 = vand.u32 2147483647, %v100_v9  ;;  %vm123_vm9 = vcmp.ge.f32.partialorder %v99_v63, 0.0 }
  0x3e   :  { %v102_v1 = vadd.f32 1.0, %v101_v0  ;;  %v121_v17 = vmul.f32 0.5, %v120_v14 }
  0x40   :  { %v103_v2 = vmul.f32 0.5, %v102_v1 }
  0x42   :  { %229 = vrsqrt.f32 %v103_v2  ;;  %vm110_vm6 = vweird.f32 %v103_v2  ;;  %v114_v10 = vmul.f32 0.5, %v103_v2 }
  0x48   :  { %v230_v4 = vpop.eup %229 }
  0x49   :  { %v105_v5 = vmul.f32 %v230_v4, %v103_v2  ;;  %vm111_vm7 = vweird.f32 %v230_v4 }
  0x4a   :  { %vm112_vm8 = vmor %vm110_vm6, %vm111_vm7 }
  0x4b   :  { %v106_v6 = vmul.f32 %v230_v4, %v105_v5 }
  0x4d   :  { %v107_v7 = vmul.f32 0.5, %v106_v6 }
  0x4f   :  { %v108_v8 = vsub.f32 1.5, %v107_v7 }
  0x51   :  { %v109_v11 = vmul.f32 %v230_v4, %v108_v8 }
  0x53   :  { %v113_v12 = vsel %vm112_vm8, %v230_v4, %v109_v11 }
  0x54   :  { %v115_v13 = vmul.f32 %v114_v10, %v113_v12 }
  0x56   :  { %v116_v15 = vmul.f32 %v115_v13, %v113_v12 }
  0x58   :  { %v117_v16 = vsub.f32 1.5, %v116_v15 }
  0x5a   :  { %v118_v20 = vmul.f32 %v117_v16, %v113_v12 }
  0x5c   :  { %v119_v21 = vmul.f32 %v118_v20, %v103_v2  ;;  %v122_v22 = vmul.f32 %v121_v17, %v118_v20 }
  0x5e   :  { %v124_v24 = vsel %vm123_vm9, %v119_v21, %v122_v22  ;;  %v125_v25 = vsel %vm123_vm9, %v122_v22, %v119_v21 }
  0x5f   :  { %v127_v26 = vsub.f32 0.0, %v125_v25  ;;  %v132_v27 = vsel %vm335_vm5, 1.0, %v124_v24 }
  0x60   :  { %v134_v28 = vmul.f32 %v132_v27, %v315_v29  ;;  %v137_v33 = vmul.f32 %v132_v27, %v317_v30  ;;  %v140_v34 = vmul.f32 %v132_v27, %v319_v31  ;;  %v143_v35 = vmul.f32 %v132_v27, %v305_v18 }
  0x61   :  { %v128_v32 = vsel %vm126_vm10, %v125_v25, %v127_v26  ;;  %v146_v37 = vmul.f32 %v132_v27, %v307_v19  ;;  %v149_v38 = vmul.f32 %v132_v27, %v309_v23 }
  0x62   :  { %v133_v36 = vsel %vm335_vm5, 0.0, %v128_v32 }
  0x63   :  { %v135_v39 = vmul.f32 %v133_v36, %v305_v18  ;;  %v138_v40 = vmul.f32 %v133_v36, %v307_v19  ;;  %v141_v41 = vmul.f32 %v133_v36, %v309_v23  ;;  %v144_v42 = vmul.f32 %v133_v36, %v315_v29 }
  0x64   :  { %v147_v43 = vmul.f32 %v133_v36, %v317_v30  ;;  %v150_v44 = vmul.f32 %v133_v36, %v319_v31 }
  0x65   :  { %v136_v45 = vadd.f32 %v135_v39, %v134_v28  ;;  %v139_v46 = vadd.f32 %v138_v40, %v137_v33  ;;  %v142_v47 = vadd.f32 %v141_v41, %v140_v34  ;;  %v145_v48 = vsub.f32 %v143_v35, %v144_v42 }
  0x66   :  { %v148_v49 = vsub.f32 %v146_v37, %v147_v43  ;;  %v151_v50 = vsub.f32 %v149_v38, %v150_v44 }
  0x67   :  { %v152_v51 = vmul.f32 2.0, %v136_v45  ;;  %v154_v52 = vmul.f32 2.0, %v139_v46  ;;  %v157_v53 = vmul.f32 2.0, %v142_v47  ;;  %v160_v18 = vmul.f32 2.0, %v145_v48 }
  0x68   :  { %v172_v54 = vmul.f32 %v145_v48, %v142_v47  ;;  %v176_v19 = vmul.f32 %v145_v48, %v139_v46  ;;  %v175_v55 = vmul.f32 %v148_v49, %v136_v45  ;;  %v163_v23 = vmul.f32 2.0, %v148_v49 }
  0x69   :  { %153 = vst [vmem:[#allocation5] sm:$0xff] %v152_v51  ;;  %v173_v29 = vmul.f32 %v151_v50, %v136_v45  ;;  %v169_v56 = vmul.f32 %v151_v50, %v139_v46  ;;  %v170_v30 = vmul.f32 %v148_v49, %v142_v47  ;;  %v166_v57 = vmul.f32 2.0, %v151_v50 }
  0x6a   :  { %156 = vst [vmem:[#allocation5 + $0x18] sm:$0xff] %v154_v52  ;;  %v177_v31 = vsub.f32 %v175_v55, %v176_v19 }
  0x6b   :  { %159 = vst [vmem:[#allocation5 + $0x30] sm:$0xff] %v157_v53  ;;  %v171_v58 = vsub.f32 %v169_v56, %v170_v30  ;;  %v174_v59 = vsub.f32 %v172_v54, %v173_v29 }
  0x6c   :  { %162 = vst [vmem:[#allocation5 + $0x8] sm:$0xff] %v160_v18  ;;  %v181_v62 = vmul.f32 %v177_v31, %v177_v31 }
  0x6d   :  { %165 = vst [vmem:[#allocation5 + $0x20] sm:$0xff] %v163_v23  ;;  %v178_v60 = vmul.f32 %v171_v58, %v171_v58  ;;  %v179_v61 = vmul.f32 %v174_v59, %v174_v59 }
  0x6e   :  { %168 = vst [vmem:[#allocation5 + $0x38] sm:$0xff] %v166_v57 }
  0x6f   :  { %v180_v63 = vadd.f32 %v179_v61, %v178_v60 }
  0x71   :  { %v182_v0 = vadd.f32 %v181_v62, %v180_v63 }
  0x73   :  { %v183_v1 = vmax.f32 %v182_v0, 1e-24 }
  0x75   :  { %231 = vrsqrt.f32 %v183_v1  ;;  %vm190_vm11 = vweird.f32 %v183_v1 }
  0x7b   :  { %v232_v2 = vpop.eup %231 }
  0x7c   :  { %v185_v3 = vmul.f32 %v232_v2, %v183_v1  ;;  %vm191_vm12 = vweird.f32 %v232_v2 }
  0x7d   :  { %vm192_vm13 = vmor %vm190_vm11, %vm191_vm12 }
  0x7e   :  { %v186_v4 = vmul.f32 %v232_v2, %v185_v3 }
  0x80   :  { %v187_v5 = vmul.f32 0.5, %v186_v4 }
  0x82   :  { %v188_v6 = vsub.f32 1.5, %v187_v5 }
  0x84   :  { %v189_v7 = vmul.f32 %v232_v2, %v188_v6 }
  0x86   :  { %v193_v8 = vsel %vm192_vm13, %v232_v2, %v189_v7 }
  0x87   :  { %v194_v9 = vmul.f32 0.001, %v193_v8 }
  0x89   :  { %v195_v10 = vmul.f32 %v194_v9, %v171_v58  ;;  %v198_v11 = vmul.f32 %v194_v9, %v174_v59  ;;  %v201_v12 = vmul.f32 %v194_v9, %v177_v31 }
  0x8b   :  { %197 = vst [vmem:[#allocation5 + $0x10] sm:$0xff] %v195_v10 }
  0x8c   :  { %200 = vst [vmem:[#allocation5 + $0x28] sm:$0xff] %v198_v11 }
  0x8d   :  { %203 = vst [vmem:[#allocation5 + $0x40] sm:$0xff] %v201_v12 }
  0x8e   :  { %216 = dma.vmem_to_hbm [thread:$0]  %s209_s13, 1152, %s211_s16, [#allocation4], %s286_s11, %s286_s11, %s287_s12  }
  0x8f   :  { %283 = dma.done.wait [#allocation4], 1152  }
  0x90   :  { %284 = vsyncadd [#allocation4], 4294966144 }
  0x91   :  { %221 = vsyncpa [#allocation3], 1 }
  0x92   :  { %222 = vsyncpa [#allocation4], 1 }

</bundles_post_ra>
